<compile_context>
chip_gen: v5e
topology: v5e:2x2
jax: 0.10.0
libtpu: 0.0.40
codegen_flags: <defaults>
</compile_context>

<pallas_src>
import functools

import jax
import jax.numpy as jnp
from jax.experimental import pallas as pl
from jax.experimental.pallas import tpu as pltpu


def _round_up(n: int, m: int) -> int:
    return ((n + m - 1) // m) * m


def _dqn3_kernel(x_ref, w1_ref, b1_ref, w2_ref, b2_ref, w3_ref, b3_ref,
                 w4_ref, b4_ref, o_ref):
    """Fused MLP: relu(fc1) -> relu(fc2) -> relu(fc3) -> fc4.

    x arrives in its source dtype (f32) and is cast to bf16 on the VPU;
    weights are bf16, biases f32; every matmul accumulates in f32 on the MXU;
    bias-add and ReLU run in f32; the result is stored as bf16.
    """
    cdt = w1_ref.dtype  # bf16 MXU operand dtype

    x = x_ref[...].astype(cdt)
    h = jnp.dot(x, w1_ref[...], preferred_element_type=jnp.float32) + b1_ref[...]
    h = jnp.maximum(h, 0.0).astype(cdt)

    h = jnp.dot(h, w2_ref[...], preferred_element_type=jnp.float32) + b2_ref[...]
    h = jnp.maximum(h, 0.0).astype(cdt)

    h = jnp.dot(h, w3_ref[...], preferred_element_type=jnp.float32) + b3_ref[...]
    h = jnp.maximum(h, 0.0).astype(cdt)

    out = jnp.dot(h, w4_ref[...], preferred_element_type=jnp.float32) + b4_ref[...]
    o_ref[...] = out.astype(o_ref.dtype)


def init_dqn3_params(key, input_size, hidden_size, output_size):
    """PyTorch-style Linear init: U(-1/sqrt(fan_in), 1/sqrt(fan_in)).

    Weights kept in PyTorch layout (out_features, in_features), biases (1, out).
    """
    sizes = [(hidden_size, input_size),
             (hidden_size, hidden_size),
             (hidden_size, hidden_size),
             (output_size, hidden_size)]
    params = []
    for (fan_out, fan_in) in sizes:
        key, kw, kb = jax.random.split(key, 3)
        bound = 1.0 / jnp.sqrt(jnp.float32(fan_in))
        w = jax.random.uniform(kw, (fan_out, fan_in), jnp.float32, -bound, bound)
        b = jax.random.uniform(kb, (1, fan_out), jnp.float32, -bound, bound)
        params.append((w, b))
    return params


def prepare_dqn3_params(params, compute_dtype=jnp.bfloat16):
    """One-time prep: transpose to (in, out), zero-pad hidden/output dims to
    128 lanes, cast matmul operands to bf16 (biases stay f32).

    Layer 1 keeps exactly `in_features` rows so the kernel input x needs no
    lane padding at all.
    """
    prepped = []
    for idx, (w, b) in enumerate(params):
        out_f, in_f = w.shape
        in_p = in_f if idx == 0 else _round_up(in_f, 128)
        out_p = _round_up(out_f, 128)
        wt = jnp.zeros((in_p, out_p), compute_dtype)
        wt = wt.at[:in_f, :out_f].set(w.T.astype(compute_dtype))
        bp = jnp.zeros((1, out_p), jnp.float32)
        bp = bp.at[:, :out_f].set(b.reshape(1, -1).astype(jnp.float32))
        prepped.append((wt, bp))
    return prepped


@functools.partial(jax.jit, static_argnames=("output_size", "ram"))
def dqn3_forward(x, prepared_params, output_size, ram=True):
    """Replicates DQN3.forward on prepped params.

    PyTorch:
      x = x.view(x.size(0), -1) if x.dim() == (2 if ram else 3) else x.view(1, -1)
    """
    expected_dim = 2 if ram else 3
    if x.ndim == expected_dim:
        x2d = x.reshape(x.shape[0], -1)
    else:
        x2d = x.reshape(1, -1)

    (w1, b1), (w2, b2), (w3, b3), (w4, b4) = prepared_params
    batch, in_f = x2d.shape
    assert w1.shape[0] == in_f, "prepared W1 rows must match flattened features"
    out_p = w4.shape[1]

    # --- batch tiling -------------------------------------------------------
    if batch <= 128:
        tb = batch                                # one full-array tile, no pad
    elif batch <= 1024:
        tb = _round_up(pl.cdiv(batch, 2), 16)     # 2 tiles -> both TCs on v7x
    else:
        tb = 512                                  # big tiles amortize overhead
    pb = _round_up(batch, tb)

    if pb != batch:
        xp = jnp.zeros((pb, in_f), x2d.dtype).at[:batch].set(x2d)
    else:
        xp = x2d

    def resident(a):  # full-array block, constant index -> stays in VMEM
        return pl.BlockSpec(a.shape, lambda i: (0, 0))

    out_padded = pl.pallas_call(
        _dqn3_kernel,
        out_shape=jax.ShapeDtypeStruct((pb, out_p), jnp.bfloat16),
        grid=(pb // tb,),
        in_specs=[
            pl.BlockSpec((tb, in_f), lambda i: (i, 0)),
            resident(w1), resident(b1),
            resident(w2), resident(b2),
            resident(w3), resident(b3),
            resident(w4), resident(b4),
        ],
        out_specs=pl.BlockSpec((tb, out_p), lambda i: (i, 0)),
        compiler_params=pltpu.CompilerParams(
            dimension_semantics=("parallel",)),
    )(xp, w1, b1, w2, b2, w3, b3, w4, b4)

    return out_padded[:batch, :output_size].astype(jnp.float32)


if __name__ == "__main__":
    input_size = 16   # RAM-style flat observation
    hidden_size = 32
    output_size = 4
    batch = 2
    ram = True

    key = jax.random.PRNGKey(0)
    key, kx = jax.random.split(key)
    params = init_dqn3_params(key, input_size, hidden_size, output_size)
    prepped = prepare_dqn3_params(params)

    # ram=True -> forward expects a 2-D (batch, input_size) observation.
    x = jax.random.normal(kx, (batch, input_size), jnp.float32)

    out = dqn3_forward(x, prepped, output_size, ram=ram)
    out = jax.block_until_ready(out)

    # Pure-JAX reference emulating the kernel's bf16-operand / f32-accum matmuls.
    def ref(x, params):
        h = x.reshape(x.shape[0], -1)
        for idx, (w, b) in enumerate(params):
            hb = h.astype(jnp.bfloat16).astype(jnp.float32)
            wb = w.astype(jnp.bfloat16).astype(jnp.float32)
            h = hb @ wb.T + b.reshape(1, -1)
            if idx < len(params) - 1:
                h = jnp.maximum(h, 0.0)
        return h

    expected = ref(x, params)
    assert out.shape == (batch, output_size)
    # Kernel output is stored as bf16 (extra ~2^-8 relative rounding) -> 1e-2 tol.
    assert jnp.allclose(out, expected, atol=1e-2, rtol=1e-2)
    print("KERNEL_OK")
</pallas_src>

<mosaic_0001>
module attributes {stable_mosaic.version = 11 : i64} {
  func.func @_dqn3_kernel(%arg0: i32, %arg1: memref<2x16xf32, #tpu.memory_space<vmem>>, %arg2: memref<16x128xbf16, #tpu.memory_space<vmem>>, %arg3: memref<1x128xf32, #tpu.memory_space<vmem>>, %arg4: memref<128x128xbf16, #tpu.memory_space<vmem>>, %arg5: memref<1x128xf32, #tpu.memory_space<vmem>>, %arg6: memref<128x128xbf16, #tpu.memory_space<vmem>>, %arg7: memref<1x128xf32, #tpu.memory_space<vmem>>, %arg8: memref<128x128xbf16, #tpu.memory_space<vmem>>, %arg9: memref<1x128xf32, #tpu.memory_space<vmem>>, %arg10: memref<2x128xbf16, #tpu.memory_space<vmem>>) attributes {dimension_semantics = [#tpu.dimension_semantics<parallel>], iteration_bounds = array<i64: 1>, scalar_prefetch = 0 : i64, scratch_operands = 0 : i64, tpu.core_type = #tpu.core_type<tc>, window_params = [{transform_indices = @transform_0, window_bounds = array<i64: 2, 16>}, {pipeline_mode = #tpu.pipeline_mode<synchronous>, transform_indices = @transform_1, window_bounds = array<i64: 16, 128>}, {pipeline_mode = #tpu.pipeline_mode<synchronous>, transform_indices = @transform_2, window_bounds = array<i64: 1, 128>}, {pipeline_mode = #tpu.pipeline_mode<synchronous>, transform_indices = @transform_3, window_bounds = array<i64: 128, 128>}, {pipeline_mode = #tpu.pipeline_mode<synchronous>, transform_indices = @transform_4, window_bounds = array<i64: 1, 128>}, {pipeline_mode = #tpu.pipeline_mode<synchronous>, transform_indices = @transform_5, window_bounds = array<i64: 128, 128>}, {pipeline_mode = #tpu.pipeline_mode<synchronous>, transform_indices = @transform_6, window_bounds = array<i64: 1, 128>}, {pipeline_mode = #tpu.pipeline_mode<synchronous>, transform_indices = @transform_7, window_bounds = array<i64: 128, 128>}, {pipeline_mode = #tpu.pipeline_mode<synchronous>, transform_indices = @transform_8, window_bounds = array<i64: 1, 128>}, {transform_indices = @transform_9, window_bounds = array<i64: 2, 128>}]} {
    %c0 = arith.constant 0 : index
    %c0_0 = arith.constant 0 : index
    %0 = vector.load %arg1[%c0, %c0_0] : memref<2x16xf32, #tpu.memory_space<vmem>>, vector<2x16xf32>
    %1 = arith.truncf %0 : vector<2x16xf32> to vector<2x16xbf16>
    %c0_1 = arith.constant 0 : index
    %c0_2 = arith.constant 0 : index
    %2 = vector.load %arg2[%c0_1, %c0_2] : memref<16x128xbf16, #tpu.memory_space<vmem>>, vector<16x128xbf16>
    %cst = arith.constant dense<0.000000e+00> : vector<2x128xf32>
    %3 = tpu.matmul %1, %2, %cst {dimension_numbers = #tpu.dot_dimension_numbers<[1], [0], [0], [1], [0, 0, 1, 1], [], []>} : vector<2x16xbf16>, vector<16x128xbf16>, vector<2x128xf32> -> vector<2x128xf32>
    %c0_3 = arith.constant 0 : index
    %c0_4 = arith.constant 0 : index
    %4 = vector.load %arg3[%c0_3, %c0_4] : memref<1x128xf32, #tpu.memory_space<vmem>>, vector<1x128xf32>
    %5 = vector.broadcast %4 : vector<1x128xf32> to vector<2x128xf32>
    %6 = arith.addf %3, %5 : vector<2x128xf32>
    %cst_5 = arith.constant 0.000000e+00 : f32
    %7 = vector.broadcast %cst_5 : f32 to vector<2x128xf32>
    %8 = arith.maximumf %6, %7 : vector<2x128xf32>
    %9 = arith.truncf %8 : vector<2x128xf32> to vector<2x128xbf16>
    %c0_6 = arith.constant 0 : index
    %c0_7 = arith.constant 0 : index
    %10 = vector.load %arg4[%c0_6, %c0_7] : memref<128x128xbf16, #tpu.memory_space<vmem>>, vector<128x128xbf16>
    %cst_8 = arith.constant dense<0.000000e+00> : vector<2x128xf32>
    %11 = tpu.matmul %9, %10, %cst_8 {dimension_numbers = #tpu.dot_dimension_numbers<[1], [0], [0], [1], [0, 0, 1, 1], [], []>} : vector<2x128xbf16>, vector<128x128xbf16>, vector<2x128xf32> -> vector<2x128xf32>
    %c0_9 = arith.constant 0 : index
    %c0_10 = arith.constant 0 : index
    %12 = vector.load %arg5[%c0_9, %c0_10] : memref<1x128xf32, #tpu.memory_space<vmem>>, vector<1x128xf32>
    %13 = vector.broadcast %12 : vector<1x128xf32> to vector<2x128xf32>
    %14 = arith.addf %11, %13 : vector<2x128xf32>
    %cst_11 = arith.constant 0.000000e+00 : f32
    %15 = vector.broadcast %cst_11 : f32 to vector<2x128xf32>
    %16 = arith.maximumf %14, %15 : vector<2x128xf32>
    %17 = arith.truncf %16 : vector<2x128xf32> to vector<2x128xbf16>
    %c0_12 = arith.constant 0 : index
    %c0_13 = arith.constant 0 : index
    %18 = vector.load %arg6[%c0_12, %c0_13] : memref<128x128xbf16, #tpu.memory_space<vmem>>, vector<128x128xbf16>
    %cst_14 = arith.constant dense<0.000000e+00> : vector<2x128xf32>
    %19 = tpu.matmul %17, %18, %cst_14 {dimension_numbers = #tpu.dot_dimension_numbers<[1], [0], [0], [1], [0, 0, 1, 1], [], []>} : vector<2x128xbf16>, vector<128x128xbf16>, vector<2x128xf32> -> vector<2x128xf32>
    %c0_15 = arith.constant 0 : index
    %c0_16 = arith.constant 0 : index
    %20 = vector.load %arg7[%c0_15, %c0_16] : memref<1x128xf32, #tpu.memory_space<vmem>>, vector<1x128xf32>
    %21 = vector.broadcast %20 : vector<1x128xf32> to vector<2x128xf32>
    %22 = arith.addf %19, %21 : vector<2x128xf32>
    %cst_17 = arith.constant 0.000000e+00 : f32
    %23 = vector.broadcast %cst_17 : f32 to vector<2x128xf32>
    %24 = arith.maximumf %22, %23 : vector<2x128xf32>
    %25 = arith.truncf %24 : vector<2x128xf32> to vector<2x128xbf16>
    %c0_18 = arith.constant 0 : index
    %c0_19 = arith.constant 0 : index
    %26 = vector.load %arg8[%c0_18, %c0_19] : memref<128x128xbf16, #tpu.memory_space<vmem>>, vector<128x128xbf16>
    %cst_20 = arith.constant dense<0.000000e+00> : vector<2x128xf32>
    %27 = tpu.matmul %25, %26, %cst_20 {dimension_numbers = #tpu.dot_dimension_numbers<[1], [0], [0], [1], [0, 0, 1, 1], [], []>} : vector<2x128xbf16>, vector<128x128xbf16>, vector<2x128xf32> -> vector<2x128xf32>
    %c0_21 = arith.constant 0 : index
    %c0_22 = arith.constant 0 : index
    %28 = vector.load %arg9[%c0_21, %c0_22] : memref<1x128xf32, #tpu.memory_space<vmem>>, vector<1x128xf32>
    %29 = vector.broadcast %28 : vector<1x128xf32> to vector<2x128xf32>
    %30 = arith.addf %27, %29 : vector<2x128xf32>
    %31 = arith.truncf %30 : vector<2x128xf32> to vector<2x128xbf16>
    %c0_23 = arith.constant 0 : index
    %c0_24 = arith.constant 0 : index
    %32 = vector.load %arg10[%c0_23, %c0_24] : memref<2x128xbf16, #tpu.memory_space<vmem>>, vector<2x128xbf16>
    tpu.vector_store %arg10[%c0_23, %c0_24], %31 {strides = array<i32>} : memref<2x128xbf16, #tpu.memory_space<vmem>>, vector<2x128xbf16>,
    return
  }
  func.func @transform_0(%arg0: i32) -> (i32, i32) {
    %c0_i32 = arith.constant 0 : i32
    %c0_i32_0 = arith.constant 0 : i32
    return %arg0, %c0_i32 : i32, i32
  }
  func.func @transform_1(%arg0: i32) -> (i32, i32) {
    %c0_i32 = arith.constant 0 : i32
    %c0_i32_0 = arith.constant 0 : i32
    %c0_i32_1 = arith.constant 0 : i32
    return %c0_i32, %c0_i32_0 : i32, i32
  }
  func.func @transform_2(%arg0: i32) -> (i32, i32) {
    %c0_i32 = arith.constant 0 : i32
    %c0_i32_0 = arith.constant 0 : i32
    %c0_i32_1 = arith.constant 0 : i32
    return %c0_i32, %c0_i32_0 : i32, i32
  }
  func.func @transform_3(%arg0: i32) -> (i32, i32) {
    %c0_i32 = arith.constant 0 : i32
    %c0_i32_0 = arith.constant 0 : i32
    %c0_i32_1 = arith.constant 0 : i32
    return %c0_i32, %c0_i32_0 : i32, i32
  }
  func.func @transform_4(%arg0: i32) -> (i32, i32) {
    %c0_i32 = arith.constant 0 : i32
    %c0_i32_0 = arith.constant 0 : i32
    %c0_i32_1 = arith.constant 0 : i32
    return %c0_i32, %c0_i32_0 : i32, i32
  }
  func.func @transform_5(%arg0: i32) -> (i32, i32) {
    %c0_i32 = arith.constant 0 : i32
    %c0_i32_0 = arith.constant 0 : i32
    %c0_i32_1 = arith.constant 0 : i32
    return %c0_i32, %c0_i32_0 : i32, i32
  }
  func.func @transform_6(%arg0: i32) -> (i32, i32) {
    %c0_i32 = arith.constant 0 : i32
    %c0_i32_0 = arith.constant 0 : i32
    %c0_i32_1 = arith.constant 0 : i32
    return %c0_i32, %c0_i32_0 : i32, i32
  }
  func.func @transform_7(%arg0: i32) -> (i32, i32) {
    %c0_i32 = arith.constant 0 : i32
    %c0_i32_0 = arith.constant 0 : i32
    %c0_i32_1 = arith.constant 0 : i32
    return %c0_i32, %c0_i32_0 : i32, i32
  }
  func.func @transform_8(%arg0: i32) -> (i32, i32) {
    %c0_i32 = arith.constant 0 : i32
    %c0_i32_0 = arith.constant 0 : i32
    %c0_i32_1 = arith.constant 0 : i32
    return %c0_i32, %c0_i32_0 : i32, i32
  }
  func.func @transform_9(%arg0: i32) -> (i32, i32) {
    %c0_i32 = arith.constant 0 : i32
    %c0_i32_0 = arith.constant 0 : i32
    return %arg0, %c0_i32 : i32, i32
  }
}

</mosaic_0001>

<bundles_post_ra>
// kernel: dqn3_forward.1
= control target key start
LH: loop header
LB: loop body
LE: loop exit
PB: predicated region body
PF: predicated region fallthrough
CT: control target
= control target key end

     0   :  { %14 = vsyncpa [#allocation3], 0  ;;  %s748_s0 = inlined_call_operand.hbm [shape: f32[2,16], index: 0, kind: input, shape index: {}]   ;;  %s749_s1 = inlined_call_operand.hbm [shape: bf16[16,128], index: 1, kind: input, shape index: {}]   ;;  %s750_s2 = inlined_call_operand.vmem [shape: f32[1,128], index: 2, kind: input, shape index: {}]   ;;  %s751_s3 = inlined_call_operand.hbm [shape: bf16[128,128], index: 3, kind: input, shape index: {}]   ;;  %s752_s4 = inlined_call_operand.vmem [shape: f32[1,128], index: 4, kind: input, shape index: {}]   ;;  %s753_s5 = inlined_call_operand.hbm [shape: bf16[128,128], index: 5, kind: input, shape index: {}]   ;;  %s754_s6 = inlined_call_operand.vmem [shape: f32[1,128], index: 6, kind: input, shape index: {}]   ;;  %s755_s7 = inlined_call_operand.hbm [shape: bf16[128,128], index: 7, kind: input, shape index: {}]   ;;  %s756_s8 = inlined_call_operand.vmem [shape: f32[1,128], index: 8, kind: input, shape index: {}]   ;;  %s757_s9 = inlined_call_operand.vmem [shape: bf16[2,128], index: 9, kind: output, shape index: {}]  }
   0x1   :  { %15 = vsyncpa [#allocation5], 0  ;;  %s32_s11 = sshll.u32 %s749_s1, 4  ;;  %s33_s11 = int_to_ptr.hbm [resolvable:$true] %s32_s11 }
   0x2   :  { %16 = vsyncpa [#allocation8], 0  ;;  %s661_s12 = smov [#allocation4]   ;;  %s62_s16 = sshll.u32 %s753_s5, 4  ;;  %s63_s16 = int_to_ptr.hbm [resolvable:$true] %s62_s16 }
   0x3   :  { %s34_s13 = sshll.u32 %s661_s12, 4  ;;  %s662_s17 = smov 64   ;;  %s35_s13 = int_to_ptr.vmem [resolvable:$true] %s34_s13 }
   0x4   :  { %s663_s18 = smov 4   ;;  %s664_s19 = smov [#allocation7]  }
   0x5   :  { %40 = dma.hbm_to_vmem [thread:$0]  %s33_s11, 128, %s35_s13, [#allocation5], %s662_s17, %s662_s17, %s663_s18  }
   0x6   :  { %s64_s20 = sshll.u32 %s664_s19, 4  ;;  %s22_s23 = sshll.u32 %s748_s0, 4  ;;  %s65_s20 = int_to_ptr.vmem [resolvable:$true] %s64_s20  ;;  %s23_s23 = int_to_ptr.hbm [resolvable:$true] %s22_s23 }
   0x7   :  { %70 = dma.hbm_to_vmem [thread:$0]  %s63_s16, 1024, %s65_s20, [#allocation8], %s662_s17, %s662_s17, %s663_s18  }
   0x8   :  { %s47_s25 = sshll.u32 %s751_s3, 4  ;;  %s665_s26 = smov [#allocation2]   ;;  %s48_s25 = int_to_ptr.hbm [resolvable:$true] %s47_s25 }
   0x9   :  { %s24_s27 = sshll.u32 %s665_s26, 4  ;;  %s666_s5 = smov [#allocation6]   ;;  %s25_s27 = int_to_ptr.vmem [resolvable:$true] %s24_s27 }
   0xa   :  { %27 = dma.hbm_to_vmem [thread:$0]  %s23_s23, 32, %s25_s27, [#allocation3]  }
   0xb   :  { %s49_s28 = sshll.u32 %s666_s5, 4  ;;  %s77_s10 = sshll.u32 %s755_s7, 4  ;;  %s50_s28 = int_to_ptr.vmem [resolvable:$true] %s49_s28  ;;  %s78_s10 = int_to_ptr.hbm [resolvable:$true] %s77_s10 }
   0xc   :  { %55 = dma.hbm_to_vmem [thread:$0]  %s48_s25, 1024, %s50_s28, [#allocation5], %s662_s17, %s662_s17, %s663_s18  }
   0xd   :  { %s667_s0 = smov [#allocation9]  }
   0xe   :  { %s79_s11 = sshll.u32 %s667_s0, 4  ;;  %s80_s11 = int_to_ptr.vmem [resolvable:$true] %s79_s11 }
   0xf   :  { %85 = dma.hbm_to_vmem [thread:$0]  %s78_s10, 1024, %s80_s11, [#allocation8], %s662_s17, %s662_s17, %s663_s18  }
  0x10   :  { %655 = dma.done.wait [#allocation3], 32  }
  0x11   :  { %656 = vsyncadd [#allocation3], 4294967264 }
  0x12   :  { %657 = dma.done.wait [#allocation5], 1152  }
  0x13   :  { %658 = vsyncadd [#allocation5], 4294966144 }
  0x14   :  { %659 = dma.done.wait [#allocation8], 2048  }
  0x15   :  { %660 = vsyncadd [#allocation8], 4294965248  ;;  %v499_v0 = vld [vmem:[#allocation4] sm:$0xff]  ;;  %v109_v1 = vld [vmem:[#allocation2] sm:$0x3]  ;;  %vm123_vm0 = vcmask 130048  }
  0x16   :  { %v507_v2 = vld [vmem:[#allocation6 + $0x38] sm:$0xff]  ;;  %v110_v3 = vpack.c.bf16 %v109_v1, %v109_v1  ;;  %134 = vmatpush.bf16.msra.mxu0 %v499_v0  ;;  %v506_v4 = vld [vmem:[#allocation6 + $0x30] sm:$0xff]  ;;  %v505_v5 = vld [vmem:[#allocation6 + $0x28] sm:$0xff] }
  0x17   :  { %210 = vmatpush.bf16.msra.mxu1 %v507_v2  ;;  %v504_v6 = vld [vmem:[#allocation6 + $0x20] sm:$0xff]  ;;  %v503_v7 = vld [vmem:[#allocation6 + $0x18] sm:$0xff]  ;;  %v502_v8 = vld [vmem:[#allocation6 + $0x10] sm:$0xff] }
  0x18   :  { %v501_v9 = vld [vmem:[#allocation6 + $0x8] sm:$0xff]  ;;  %v500_v10 = vld [vmem:[#allocation6] sm:$0xff]  ;;  %v515_v11 = vld [vmem:[#allocation7 + $0x38] sm:$0xff] }
  0x19   :  { %402 = vmatmul.msk.bf16.vlgmr.msra.gmra.mxu0 %vm123_vm0, %v110_v3  ;;  %293 = vmatpush.bf16.msra.mxu2 %v515_v11  ;;  %v514_v12 = vld [vmem:[#allocation7 + $0x30] sm:$0xff]  ;;  %v513_v13 = vld [vmem:[#allocation7 + $0x28] sm:$0xff]  ;;  %v512_v14 = vld [vmem:[#allocation7 + $0x20] sm:$0xff] }
  0x1a   :  { %v511_v15 = vld [vmem:[#allocation7 + $0x18] sm:$0xff]  ;;  %v510_v16 = vld [vmem:[#allocation7 + $0x10] sm:$0xff]  ;;  %v509_v23 = vld [vmem:[#allocation7 + $0x8] sm:$0xff] }
  0x1b   :  { %211 = vmatpush.bf16.msra.mxu1 %v506_v4  ;;  %v531_v17 = vld [vmem:[%s750_s2] ss:$0 sm:$0xff]  ;;  %v508_v24 = vld [vmem:[#allocation7] sm:$0xff]  ;;  %v523_v25 = vld [vmem:[#allocation9 + $0x38] sm:$0xff] }
  0x1c   :  { %376 = vmatpush.bf16.msra.mxu3 %v523_v25  ;;  %v522_v26 = vld [vmem:[#allocation9 + $0x30] sm:$0xff]  ;;  %v521_v27 = vld [vmem:[#allocation9 + $0x28] sm:$0xff]  ;;  %v520_v28 = vld [vmem:[#allocation9 + $0x20] sm:$0xff] }
  0x1d   :  { %294 = vmatpush.bf16.msra.mxu2 %v514_v12  ;;  %v519_v29 = vld [vmem:[#allocation9 + $0x18] sm:$0xff]  ;;  %v518_v30 = vld [vmem:[#allocation9 + $0x10] sm:$0xff]  ;;  %v517_v37 = vld [vmem:[#allocation9 + $0x8] sm:$0xff] }
  0x1e   :  { %v532_v31 = vld [vmem:[%s752_s4] ss:$0 sm:$0xff]  ;;  %v516_v38 = vld [vmem:[#allocation9] sm:$0xff] }
  0x1f   :  { %212 = vmatpush.bf16.msra.mxu1 %v505_v5  ;;  %v533_v39 = vld [vmem:[%s754_s6] ss:$0 sm:$0xff] }
  0x20   :  { %377 = vmatpush.bf16.msra.mxu3 %v522_v26  ;;  %v534_v45 = vld [vmem:[%s756_s8] ss:$0 sm:$0xff] }
  0x21   :  { %295 = vmatpush.bf16.msra.mxu2 %v513_v13 }
  0x23   :  { %213 = vmatpush.bf16.msra.mxu1 %v504_v6 }
  0x24   :  { %378 = vmatpush.bf16.msra.mxu3 %v521_v27 }
  0x25   :  { %296 = vmatpush.bf16.msra.mxu2 %v512_v14 }
  0x27   :  { %214 = vmatpush.bf16.msra.mxu1 %v503_v7 }
  0x28   :  { %379 = vmatpush.bf16.msra.mxu3 %v520_v28 }
  0x29   :  { %297 = vmatpush.bf16.msra.mxu2 %v511_v15 }
  0x2b   :  { %215 = vmatpush.bf16.msra.mxu1 %v502_v8 }
  0x2c   :  { %380 = vmatpush.bf16.msra.mxu3 %v519_v29 }
  0x2d   :  { %298 = vmatpush.bf16.msra.mxu2 %v510_v16 }
  0x2f   :  { %216 = vmatpush.bf16.msra.mxu1 %v501_v9 }
  0x30   :  { %381 = vmatpush.bf16.msra.mxu3 %v518_v30 }
  0x31   :  { %299 = vmatpush.bf16.msra.mxu2 %v509_v23 }
  0x33   :  { %217 = vmatpush.bf16.msra.mxu1 %v500_v10 }
  0x34   :  { %382 = vmatpush.bf16.msra.mxu3 %v517_v37 }
  0x35   :  { %300 = vmatpush.bf16.msra.mxu2 %v508_v24 }
  0x38   :  { %383 = vmatpush.bf16.msra.mxu3 %v516_v38 }
  0x96   :  { %v136_v18 = vpop.f32.mrf.mxu0 }
  0x97   :  { %v137_v19 = vadd.f32 %v531_v17, %v136_v18 }
  0x99   :  { %v140_v20 = vmax.f32 %v137_v19, 0.0 }
  0x9b   :  { %v141_v21 = vpack.c.bf16 %v140_v20, %v140_v20 }
  0x9d   :  { %218 = vmatmul.bf16.vlgmr.msra.gmra.mxu1 %v141_v21 }
  0x9e   :  { %v138_v22 = vpop.f32.mrf.mxu0 }
 0x11a   :  { %v219_v32 = vpop.f32.mrf.mxu1 }
 0x11b   :  { %v220_v33 = vadd.f32 %v532_v31, %v219_v32 }
 0x11d   :  { %v223_v34 = vmax.f32 %v220_v33, 0.0 }
 0x11f   :  { %v224_v35 = vpack.c.bf16 %v223_v34, %v223_v34 }
 0x121   :  { %301 = vmatmul.bf16.vlgmr.msra.gmra.mxu2 %v224_v35 }
 0x122   :  { %v221_v36 = vpop.f32.mrf.mxu1 }
 0x1a4   :  { %v302_v40 = vpop.f32.mrf.mxu2 }
 0x1a5   :  { %v303_v41 = vadd.f32 %v533_v39, %v302_v40 }
 0x1a7   :  { %v306_v42 = vmax.f32 %v303_v41, 0.0 }
 0x1a9   :  { %v307_v43 = vpack.c.bf16 %v306_v42, %v306_v42 }
 0x1ab   :  { %384 = vmatmul.bf16.vlgmr.msra.gmra.mxu3 %v307_v43 }
 0x1ac   :  { %v304_v44 = vpop.f32.mrf.mxu2 }
 0x22e   :  { %v385_v46 = vpop.f32.mrf.mxu3 }
 0x22f   :  { %v386_v47 = vadd.f32 %v534_v45, %v385_v46 }
 0x231   :  { %v389_v48 = vpack.c.bf16 %v386_v47, %v386_v47 }
 0x233   :  { %390 = vst [vmem:[%s757_s9] sm:$0x1] %v389_v48 }
 0x236   :  { %v387_v49 = vpop.f32.mrf.mxu3 }
 0x237   :  { %395 = vsyncpa [#allocation3], 1 }
 0x238   :  { %396 = vsyncpa [#allocation5], 1 }
 0x239   :  { %397 = vsyncpa [#allocation8], 1 }

</bundles_post_ra>
